<compile_context>
chip_gen: v5e
topology: v5e:2x2
jax: 0.10.0
libtpu: 0.0.40
codegen_flags: <defaults>
</compile_context>

<pallas_src>
import jax
import jax.numpy as jnp
from jax.experimental import pallas as pl
from jax.experimental.pallas import tpu as pltpu


def _window(i, in_size, out_size):
    """PyTorch adaptive pooling window: [floor(i*in/out), ceil((i+1)*in/out))."""
    start = (i * in_size) // out_size
    end = ((i + 1) * in_size + out_size - 1) // out_size
    return start, end


def _avg_pool_matrix(in_size, out_size):
    """(in_size, out_size) f32 matrix: column o averages its adaptive window."""
    m = [[0.0] * out_size for _ in range(in_size)]
    for o in range(out_size):
        s, e = _window(o, in_size, out_size)
        inv = 1.0 / float(e - s)
        for i in range(s, e):
            m[i][o] = inv
    return jnp.array(m, dtype=jnp.float32)


def _make_avg_kernel(in_h, in_w, out_h, out_w):
    def kernel(x_ref, pw_ref, o_ref):
        pw = pw_ref[...]  # (W, OW) f32 averaging matrix (trace-time constant input)
        for oh in range(out_h):
            hs, he = _window(oh, in_h, out_h)
            # Stage 1: sum the adaptive H-window (sublane axis), f32 accumulate.
            row = jnp.sum(x_ref[:, hs:he, :], axis=1, dtype=jnp.float32)  # (GT, W)
            row = row * (1.0 / float(he - hs))
            # Stage 2: all OW windows at once as one MXU matmul; one store per oh.
            vals = jnp.dot(row, pw, preferred_element_type=jnp.float32)   # (GT, OW)
            o_ref[:, pl.ds(oh, 1), :] = vals[:, None, :].astype(o_ref.dtype)

    return kernel


def _make_max_kernel(in_h, in_w, out_h, out_w):
    # TODO(synk): for very large output_size, replace the trace-time unroll with
    # a fori_loop over SMEM (start, size) tables to bound compile time.
    def kernel(x_ref, o_ref):
        for oh in range(out_h):
            hs, he = _window(oh, in_h, out_h)
            # Stage 1: max over the adaptive H-window (sublane axis).
            row = jnp.max(x_ref[:, hs:he, :], axis=1)                      # (GT, W)
            cols = []
            for ow in range(out_w):
                ws, we = _window(ow, in_w, out_w)
                # Stage 2: max over the adaptive W-window (lane axis).
                cols.append(jnp.max(row[:, ws:we], axis=1, keepdims=True))  # (GT, 1)
            vals = jnp.concatenate(cols, axis=1)                            # (GT, OW)
            o_ref[:, pl.ds(oh, 1), :] = vals[:, None, :].astype(o_ref.dtype)

    return kernel


def _padded_tile_bytes(rows, cols, itemsize):
    """VMEM footprint of a (rows, cols) tile including sublane/lane padding."""
    sub = {1: 32, 2: 16, 4: 8}.get(itemsize, 8)
    pr = -(-rows // sub) * sub
    pc = -(-cols // 128) * 128
    return pr * pc * itemsize


def _choose_g_tile(g, per_plane_bytes, budget_bytes):
    """Largest divisor of g whose double-buffered block fits the VMEM budget.

    Keeps at least two grid steps when g >= 2 so dual-TC parts (v7x) shard the
    'parallel' grid axis across both TensorCores.
    """
    cap = max(budget_bytes // (2 * per_plane_bytes), 1)
    hi = min(cap, g // 2 if g >= 2 else g)
    hi = max(hi, 1)
    for d in range(hi, 0, -1):
        if g % d == 0:
            return d
    return 1


def adaptive_pool2d_flatten(x, output_size, method="AVG"):
    """Equivalent of torch.flatten(AdaptiveXPool2d(output_size)(x), 1, -1)."""
    if isinstance(output_size, int):
        out_h = out_w = output_size
    else:
        out_h, out_w = output_size
    n, c, h, w = x.shape
    g = n * c
    itemsize = jnp.dtype(x.dtype).itemsize

    # Free, contiguity-preserving collapse of (N, C) -> fused plane axis.
    x3 = x.reshape(g, h, w)

    try:
        vmem_cap = pltpu.get_tpu_info().vmem_capacity_bytes
    except Exception:
        vmem_cap = 64 * 1024 * 1024  # conservative default (v7x per-TC VMEM)

    # Padded VMEM accounting (input plane + output plane, true itemsize).
    plane_in = _padded_tile_bytes(h, w, itemsize)
    plane_out = _padded_tile_bytes(out_h, out_w, itemsize)
    per_plane = plane_in + plane_out
    usable = max(min(vmem_cap - (16 << 20), 64 << 20), 8 << 20)
    gt = _choose_g_tile(g, per_plane, usable)
    grid = (g // gt,)

    pw_bytes = _padded_tile_bytes(w, out_w, 4) if method == "AVG" else 0
    vmem_limit = 2 * gt * per_plane + 2 * pw_bytes + (8 << 20)
    vmem_limit = max(vmem_limit, 32 << 20)
    vmem_limit = min(vmem_limit, vmem_cap - (8 << 20))

    cost = pl.CostEstimate(
        flops=2 * g * h * w + 2 * g * w * out_h * out_w,
        transcendentals=0,
        bytes_accessed=x.nbytes + g * out_h * out_w * itemsize,
    )

    in_specs = [pl.BlockSpec((gt, h, w), lambda i: (i, 0, 0))]
    args = [x3]
    if method == "AVG":
        kernel = _make_avg_kernel(h, w, out_h, out_w)
        in_specs.append(pl.BlockSpec((w, out_w), lambda i: (0, 0)))
        args.append(_avg_pool_matrix(w, out_w))
    else:
        kernel = _make_max_kernel(h, w, out_h, out_w)

    pooled = pl.pallas_call(
        kernel,
        out_shape=jax.ShapeDtypeStruct((g, out_h, out_w), x.dtype),
        grid=grid,
        in_specs=in_specs,
        out_specs=pl.BlockSpec((gt, out_h, out_w), lambda i: (i, 0, 0)),
        compiler_params=pltpu.CompilerParams(
            dimension_semantics=("parallel",),
            vmem_limit_bytes=int(vmem_limit),
        ),
        cost_estimate=cost,
    )(*args)

    # (N*C, OH, OW) -> (N, C*OH*OW): exactly PyTorch's flatten(1, -1) order,
    # contiguous reshape, no transpose.
    return pooled.reshape(n, c * out_h * out_w)


def _reference(x, output_size, method):
    """Pure-JAX reference for verification."""
    if isinstance(output_size, int):
        out_h = out_w = output_size
    else:
        out_h, out_w = output_size
    n, c, h, w = x.shape
    out = jnp.zeros((n, c, out_h, out_w), jnp.float32)
    xf = x.astype(jnp.float32)
    for oh in range(out_h):
        hs, he = _window(oh, h, out_h)
        for ow in range(out_w):
            ws, we = _window(ow, w, out_w)
            win = xf[:, :, hs:he, ws:we]
            if method == "AVG":
                v = jnp.mean(win, axis=(2, 3))
            else:
                v = jnp.max(win, axis=(2, 3))
            out = out.at[:, :, oh, ow].set(v)
    return out.astype(x.dtype).reshape(n, c * out_h * out_w)


if __name__ == "__main__":
    key = jax.random.PRNGKey(0)
    x = jax.random.normal(key, (2, 4, 16, 16), dtype=jnp.float32)  # NCHW

    ok = True
    for output_size in ((5, 5), (4, 4)):  # non-divisor and divisor windows
        for method in ("AVG", "MAX"):
            out = adaptive_pool2d_flatten(x, output_size, method)
            out = jax.block_until_ready(out)
            ref = _reference(x, output_size, method)
            oh, ow = output_size
            if out.shape != (2, 4 * oh * ow):
                ok = False
            if not jnp.allclose(out, ref, atol=1e-5, rtol=1e-5):
                ok = False

    if ok:
        print("KERNEL_OK")
</pallas_src>

<mosaic_0001>
module attributes {stable_mosaic.version = 11 : i64} {
  func.func @kernel(%arg0: i32, %arg1: memref<4x16x16xf32, #tpu.memory_space<vmem>>, %arg2: memref<16x5xf32, #tpu.memory_space<vmem>>, %arg3: memref<4x5x5xf32, #tpu.memory_space<vmem>>) attributes {dimension_semantics = [#tpu.dimension_semantics<parallel>], iteration_bounds = array<i64: 2>, scalar_prefetch = 0 : i64, scratch_operands = 0 : i64, tpu.core_type = #tpu.core_type<tc>, window_params = [{transform_indices = @transform_0, window_bounds = array<i64: 4, 16, 16>}, {pipeline_mode = #tpu.pipeline_mode<synchronous>, transform_indices = @transform_1, window_bounds = array<i64: 16, 5>}, {transform_indices = @transform_2, window_bounds = array<i64: 4, 5, 5>}]} {
    %c0 = arith.constant 0 : index
    %c0_0 = arith.constant 0 : index
    %0 = vector.load %arg2[%c0, %c0_0] : memref<16x5xf32, #tpu.memory_space<vmem>>, vector<16x5xf32>
    %c0_1 = arith.constant 0 : index
    %c0_2 = arith.constant 0 : index
    %c0_3 = arith.constant 0 : index
    %1 = vector.load %arg1[%c0_1, %c0_2, %c0_3] : memref<4x16x16xf32, #tpu.memory_space<vmem>>, vector<4x4x16xf32>
    %cst = arith.constant dense<0.000000e+00> : vector<4x16xf32>
    %2 = vector.multi_reduction <add>, %1, %cst [1] : vector<4x4x16xf32> to vector<4x16xf32>
    %cst_4 = arith.constant 2.500000e-01 : f32
    %3 = vector.broadcast %cst_4 : f32 to vector<4x16xf32>
    %4 = arith.mulf %2, %3 : vector<4x16xf32>
    %cst_5 = arith.constant dense<0.000000e+00> : vector<4x5xf32>
    %5 = tpu.matmul %4, %0, %cst_5 {dimension_numbers = #tpu.dot_dimension_numbers<[1], [0], [0], [1], [0, 0, 1, 1], [], []>} : vector<4x16xf32>, vector<16x5xf32>, vector<4x5xf32> -> vector<4x5xf32>
    %6 = vector.shape_cast %5 : vector<4x5xf32> to vector<4x1x5xf32>
    %c0_6 = arith.constant 0 : index
    %c0_7 = arith.constant 0 : index
    %c0_8 = arith.constant 0 : index
    %7 = vector.load %arg3[%c0_6, %c0_7, %c0_8] : memref<4x5x5xf32, #tpu.memory_space<vmem>>, vector<4x1x5xf32>
    tpu.vector_store %arg3[%c0_6, %c0_7, %c0_8], %6 {strides = array<i32>} : memref<4x5x5xf32, #tpu.memory_space<vmem>>, vector<4x1x5xf32>,
    %c0_9 = arith.constant 0 : index
    %c3 = arith.constant 3 : index
    %c0_10 = arith.constant 0 : index
    %8 = vector.load %arg1[%c0_9, %c3, %c0_10] : memref<4x16x16xf32, #tpu.memory_space<vmem>>, vector<4x4x16xf32>
    %cst_11 = arith.constant dense<0.000000e+00> : vector<4x16xf32>
    %9 = vector.multi_reduction <add>, %8, %cst_11 [1] : vector<4x4x16xf32> to vector<4x16xf32>
    %cst_12 = arith.constant 2.500000e-01 : f32
    %10 = vector.broadcast %cst_12 : f32 to vector<4x16xf32>
    %11 = arith.mulf %9, %10 : vector<4x16xf32>
    %cst_13 = arith.constant dense<0.000000e+00> : vector<4x5xf32>
    %12 = tpu.matmul %11, %0, %cst_13 {dimension_numbers = #tpu.dot_dimension_numbers<[1], [0], [0], [1], [0, 0, 1, 1], [], []>} : vector<4x16xf32>, vector<16x5xf32>, vector<4x5xf32> -> vector<4x5xf32>
    %13 = vector.shape_cast %12 : vector<4x5xf32> to vector<4x1x5xf32>
    %c0_14 = arith.constant 0 : index
    %c1 = arith.constant 1 : index
    %c0_15 = arith.constant 0 : index
    %14 = vector.load %arg3[%c0_14, %c1, %c0_15] : memref<4x5x5xf32, #tpu.memory_space<vmem>>, vector<4x1x5xf32>
    tpu.vector_store %arg3[%c0_14, %c1, %c0_15], %13 {strides = array<i32>} : memref<4x5x5xf32, #tpu.memory_space<vmem>>, vector<4x1x5xf32>,
    %c0_16 = arith.constant 0 : index
    %c6 = arith.constant 6 : index
    %c0_17 = arith.constant 0 : index
    %15 = vector.load %arg1[%c0_16, %c6, %c0_17] : memref<4x16x16xf32, #tpu.memory_space<vmem>>, vector<4x4x16xf32>
    %cst_18 = arith.constant dense<0.000000e+00> : vector<4x16xf32>
    %16 = vector.multi_reduction <add>, %15, %cst_18 [1] : vector<4x4x16xf32> to vector<4x16xf32>
    %cst_19 = arith.constant 2.500000e-01 : f32
    %17 = vector.broadcast %cst_19 : f32 to vector<4x16xf32>
    %18 = arith.mulf %16, %17 : vector<4x16xf32>
    %cst_20 = arith.constant dense<0.000000e+00> : vector<4x5xf32>
    %19 = tpu.matmul %18, %0, %cst_20 {dimension_numbers = #tpu.dot_dimension_numbers<[1], [0], [0], [1], [0, 0, 1, 1], [], []>} : vector<4x16xf32>, vector<16x5xf32>, vector<4x5xf32> -> vector<4x5xf32>
    %20 = vector.shape_cast %19 : vector<4x5xf32> to vector<4x1x5xf32>
    %c0_21 = arith.constant 0 : index
    %c2 = arith.constant 2 : index
    %c0_22 = arith.constant 0 : index
    %21 = vector.load %arg3[%c0_21, %c2, %c0_22] : memref<4x5x5xf32, #tpu.memory_space<vmem>>, vector<4x1x5xf32>
    tpu.vector_store %arg3[%c0_21, %c2, %c0_22], %20 {strides = array<i32>} : memref<4x5x5xf32, #tpu.memory_space<vmem>>, vector<4x1x5xf32>,
    %c0_23 = arith.constant 0 : index
    %c9 = arith.constant 9 : index
    %c0_24 = arith.constant 0 : index
    %22 = vector.load %arg1[%c0_23, %c9, %c0_24] : memref<4x16x16xf32, #tpu.memory_space<vmem>>, vector<4x4x16xf32>
    %cst_25 = arith.constant dense<0.000000e+00> : vector<4x16xf32>
    %23 = vector.multi_reduction <add>, %22, %cst_25 [1] : vector<4x4x16xf32> to vector<4x16xf32>
    %cst_26 = arith.constant 2.500000e-01 : f32
    %24 = vector.broadcast %cst_26 : f32 to vector<4x16xf32>
    %25 = arith.mulf %23, %24 : vector<4x16xf32>
    %cst_27 = arith.constant dense<0.000000e+00> : vector<4x5xf32>
    %26 = tpu.matmul %25, %0, %cst_27 {dimension_numbers = #tpu.dot_dimension_numbers<[1], [0], [0], [1], [0, 0, 1, 1], [], []>} : vector<4x16xf32>, vector<16x5xf32>, vector<4x5xf32> -> vector<4x5xf32>
    %27 = vector.shape_cast %26 : vector<4x5xf32> to vector<4x1x5xf32>
    %c0_28 = arith.constant 0 : index
    %c3_29 = arith.constant 3 : index
    %c0_30 = arith.constant 0 : index
    %28 = vector.load %arg3[%c0_28, %c3_29, %c0_30] : memref<4x5x5xf32, #tpu.memory_space<vmem>>, vector<4x1x5xf32>
    tpu.vector_store %arg3[%c0_28, %c3_29, %c0_30], %27 {strides = array<i32>} : memref<4x5x5xf32, #tpu.memory_space<vmem>>, vector<4x1x5xf32>,
    %c0_31 = arith.constant 0 : index
    %c12 = arith.constant 12 : index
    %c0_32 = arith.constant 0 : index
    %29 = vector.load %arg1[%c0_31, %c12, %c0_32] : memref<4x16x16xf32, #tpu.memory_space<vmem>>, vector<4x4x16xf32>
    %cst_33 = arith.constant dense<0.000000e+00> : vector<4x16xf32>
    %30 = vector.multi_reduction <add>, %29, %cst_33 [1] : vector<4x4x16xf32> to vector<4x16xf32>
    %cst_34 = arith.constant 2.500000e-01 : f32
    %31 = vector.broadcast %cst_34 : f32 to vector<4x16xf32>
    %32 = arith.mulf %30, %31 : vector<4x16xf32>
    %cst_35 = arith.constant dense<0.000000e+00> : vector<4x5xf32>
    %33 = tpu.matmul %32, %0, %cst_35 {dimension_numbers = #tpu.dot_dimension_numbers<[1], [0], [0], [1], [0, 0, 1, 1], [], []>} : vector<4x16xf32>, vector<16x5xf32>, vector<4x5xf32> -> vector<4x5xf32>
    %34 = vector.shape_cast %33 : vector<4x5xf32> to vector<4x1x5xf32>
    %c0_36 = arith.constant 0 : index
    %c4 = arith.constant 4 : index
    %c0_37 = arith.constant 0 : index
    %35 = vector.load %arg3[%c0_36, %c4, %c0_37] : memref<4x5x5xf32, #tpu.memory_space<vmem>>, vector<4x1x5xf32>
    tpu.vector_store %arg3[%c0_36, %c4, %c0_37], %34 {strides = array<i32>} : memref<4x5x5xf32, #tpu.memory_space<vmem>>, vector<4x1x5xf32>,
    return
  }
  func.func @transform_0(%arg0: i32) -> (i32, i32, i32) {
    %c0_i32 = arith.constant 0 : i32
    %c0_i32_0 = arith.constant 0 : i32
    %c0_i32_1 = arith.constant 0 : i32
    return %arg0, %c0_i32, %c0_i32_0 : i32, i32, i32
  }
  func.func @transform_1(%arg0: i32) -> (i32, i32) {
    %c0_i32 = arith.constant 0 : i32
    %c0_i32_0 = arith.constant 0 : i32
    %c0_i32_1 = arith.constant 0 : i32
    return %c0_i32, %c0_i32_0 : i32, i32
  }
  func.func @transform_2(%arg0: i32) -> (i32, i32, i32) {
    %c0_i32 = arith.constant 0 : i32
    %c0_i32_0 = arith.constant 0 : i32
    %c0_i32_1 = arith.constant 0 : i32
    return %arg0, %c0_i32, %c0_i32_0 : i32, i32, i32
  }
}

</mosaic_0001>

<bundles_post_ra>
// kernel: tpu_custom_call.1
= control target key start
LH: loop header
LB: loop body
LE: loop exit
PB: predicated region body
PF: predicated region fallthrough
CT: control target
= control target key end

     0   :  { %7 = vsyncpa [#allocation3], 0  ;;  %s970_s0 = inlined_call_operand.hbm [shape: f32[8,16,16], index: 0, kind: input, shape index: {}]   ;;  %s971_s1 = inlined_call_operand.vmem [shape: f32[16,5], index: 1, kind: input, shape index: {}]   ;;  %s972_s2 = inlined_call_operand.vmem [shape: f32[8,5,5], index: 2, kind: output, shape index: {}]  }
   0x1   :  { %9 = vsyncpa [#allocation3 + $0x1], 0  ;;  %s769_s9 = smov 0   ;;  %s771_s10 = smov 0  }
   0x2   :  { %s773_s11 = smov 0   ;;  %s775_s12 = smov 0  }
   0x3 LB: > { %s624_s13 = sadd.s32 4294967295, %s750_s12   ;;  %s789_s14 = sadd.s32 1, %s750_s12   ;;  %s750_s12 = sphi %s775_s12, %s979_s12   ;;  %s746_s11 = sphi %s773_s11, %s978_s11   ;;  %s742_s10 = sphi %s771_s10, %s977_s10   ;;  %s738_s9 = sphi %s769_s9, %s976_s9  }
   0x4   : > { %s19_s15 = ssub.s32 %s750_s12, %s789_s14  ;;  %s22_s16 = sadd.s32 1, %s746_s11 }
   0x5   : > { %p20_p0 = scmp.eq.s32.totalorder %s19_s15, 0  ;;  %p29_p1 = scmp.ne.s32.totalorder %s746_s11, %s742_s10 }
   0x6   : > { %p30_p2 = scmp.eq.s32.totalorder %s750_s12, 0  ;;  %p35_p3 = scmp.ne.s32.totalorder %s742_s10, %s738_s9 }
   0x7   : > { %s799_s17 = scalar_select %p20_p0, %s746_s11, %s22_s16  }
   0x8   : > { %p801_p4 = por %p30_p2, %p29_p1  ;;  %p36_p5 = scmp.eq.s32.totalorder %s624_s13, 0 }
   0x9   : > { %p651_p6 = scmp.lt.s32.totalorder %s750_s12, 2  ;;  %s109_s20 = sand.u32 1, %s746_s11  }
   0xa   : > { %p808_p7 = por %p36_p5, %p35_p3  ;;  %s628_s21 = sshll.u32 %s109_s20, 6 }
   0xb   : > { %s644_s22 = sshll.u32 %s750_s12, 6  ;;  %s113_s26 = scalar_lea.vmem [#allocation2], %s628_s21 }
   0xc   : > { %s119_s25 = scalar_lea.hbm %s970_s0, %s644_s22  ;;  %s122_s27 = sshll.u32 %s113_s26, 4  ;;  %s123_s27 = int_to_ptr.vmem [resolvable:$true] %s122_s27 }
   0xd   : > { %s120_s28 = sshll.u32 %s119_s25, 4  ;;  %p819_p8 = pnand %p651_p6, %p801_p4  ;;  %s121_s28 = int_to_ptr.hbm [resolvable:$true] %s120_s28 }
   0xe   : > { %p632_p9 = scmp.ge.s32.totalorder %s750_s12, 1  ;;  %s110_s30 = scalar_lea.sflag [#allocation3], %s109_s20 }
   0xf   : > { %s686_s3 = sshra.s32 %s121_s28, 4  ;;  %p690_p11 = pneg %p819_p8  ;;  %s687_s3 = int_to_ptr.hbm [resolvable:$true] %s686_s3 }
  0x10   : > { %s688_s4 = scalar_lea.hbm %s687_s3, 64  ;;  %s693_s7 = scalar_lea.hbm %s970_s0, 128 }
  0x11   : > { %p689_p10 = scmp.ne.s32.totalorder %s687_s3, %s688_s4  ;;  %p694_p0 = scmp.lt.s32.totalorder %s687_s3, %s970_s0 }
  0x12   : > { %p695_p1 = scmp.lt.s32.totalorder %s693_s7, %s688_s4 }
  0x13   : > { %p691_p12 = pnand %p690_p11, %p689_p10 }
  0x14   : > { %p696_p2 = por %p695_p1, %p694_p0 }
  0x15   : > { %p692_p13 = pneg %p691_p12 }
  0x17   : > { %p697_p3 = pnand %p696_p2, %p692_p13 }
  0x19   : > { %700 = shalt.err (!%p697_p3)
}
  0x1a   : > { %s752_s15 = smov 128   ;;  %s753_s16 = smov 8  }
  0x1b   : > { %650 = dma.hbm_to_vmem [thread:$0]  (!%p819_p8), %s121_s28, 1024, %s123_s27, %s110_s30, %s752_s15, %s752_s15, %s753_s16  }
  0x1c   : > { %p130_p4 = scmp.lt.s32.totalorder %s750_s12, 3 }
  0x1e   : > { %p131_p5 = pnand %p632_p9, %p130_p4 }
  0x1f   : > { %s136_s18 = sand.u32 (!%p131_p5), 1, %s742_s10  }
  0x20   : > { %134 = sbr.rel (%p131_p5) target bundleno = 224 (0xe0), region = 28  ;;  %s633_s20 = sshll.u32 (!%p131_p5), %s136_s18, 6 }
  0x21   : > { %s137_s21 = scalar_lea.sflag (!%p131_p5), [#allocation3], %s136_s18  ;;  %s838_s22 = scalar_lea.vmem (!%p131_p5), [#allocation2], %s633_s20 }
  0x25   : > { %733 = dma.done.wait (%p808_p7), %s137_s21, 1024  }
  0x26   : > { %735 = vsyncadd (%p808_p7), %s137_s21, 4294966272  ;;  %vm175_vm0 = vcmask 125952   ;;  %v170_v0 = vld [vmem:[%s971_s1 + $0x8] sm:$0xff]  ;;  %v169_v1 = vld [vmem:[%s971_s1] sm:$0xff]  ;;  %vm212_vm1 = vcmask 1041409   ;;  %vm214_vm2 = vcmask 1042434  }
  0x27   : > { %v171_v2 = vld [vmem:[%s838_s22] sm:$0xf]  ;;  %235 = vmatpush.msra.mxu0 %v170_v0  ;;  %388 = vmatpush.msra.mxu2 %v170_v0  ;;  %v172_v3 = vld [vmem:[%s838_s22 + $0x10] sm:$0xf]  ;;  %v329_v10 = vld [vmem:[%s838_s22 + $0x6] sm:$0xf] }
  0x28   : > { %v173_v4 = vld [vmem:[%s838_s22 + $0x20] sm:$0xf]  ;;  %v174_v5 = vld [vmem:[%s838_s22 + $0x30] sm:$0xf]  ;;  %464 = vmatpush.msra.mxu3 %v170_v0  ;;  %v176_v6 = vsel %vm175_vm0, %v171_v2, 0.0  ;;  %v183_v7 = vsel %vm175_vm0, %v172_v3, 0.0  ;;  %312 = vmatpush.msra.mxu1 %v170_v0 }
  0x29   : > { %v190_v8 = vsel %vm175_vm0, %v173_v4, 0.0  ;;  %v197_v9 = vsel %vm175_vm0, %v174_v5, 0.0  ;;  %236 = vmatpush.msra.mxu0 %v169_v1  ;;  %389 = vmatpush.msra.mxu2 %v169_v1  ;;  %v177_v11 = vrot.slane %v176_v6, 4  ;;  %v184_v12 = vrot.slane %v183_v7, 4  ;;  %v330_v15 = vld [vmem:[%s838_s22 + $0x16] sm:$0xf] }
  0x2a   : > { %v191_v13 = vrot.slane %v190_v8, 4  ;;  %v198_v14 = vrot.slane %v197_v9, 4  ;;  %465 = vmatpush.msra.mxu3 %v169_v1  ;;  %v331_v16 = vld [vmem:[%s838_s22 + $0x26] sm:$0xf]  ;;  %v332_v17 = vld [vmem:[%s838_s22 + $0x36] sm:$0xf]  ;;  %313 = vmatpush.msra.mxu1 %v169_v1 }
  0x2b   : > { %v333_v18 = vsel %vm175_vm0, %v329_v10, 0.0  ;;  %v340_v19 = vsel %vm175_vm0, %v330_v15, 0.0  ;;  %540 = vmatpush.msrb.mxu0 %v170_v0  ;;  %v178_v20 = vadd.f32 %v177_v11, %v176_v6  ;;  %v185_v21 = vadd.f32 %v184_v12, %v183_v7  ;;  %v405_v56 = vld [vmem:[%s838_s22 + $0x9] sm:$0xf]  ;;  %v406_v61 = vld [vmem:[%s838_s22 + $0x19] sm:$0xf] }
  0x2c   : > { %v192_v22 = vadd.f32 %v191_v13, %v190_v8  ;;  %v199_v23 = vadd.f32 %v198_v14, %v197_v9  ;;  %v334_v24 = vrot.slane %v333_v18, 4  ;;  %v341_v25 = vrot.slane %v340_v19, 4  ;;  %v407_v62 = vld [vmem:[%s838_s22 + $0x29] sm:$0xf]  ;;  %v408_v8 = vld [vmem:[%s838_s22 + $0x39] sm:$0xf] }
  0x2d   : > { %v347_v26 = vsel %vm175_vm0, %v331_v16, 0.0  ;;  %v354_v27 = vsel %vm175_vm0, %v332_v17, 0.0  ;;  %541 = vmatpush.msrb.mxu0 %v169_v1  ;;  %v179_v28 = vrot.slane %v178_v20, 2  ;;  %v186_v29 = vrot.slane %v185_v21, 2  ;;  %v253_v16 = vld [vmem:[%s838_s22 + $0x3] sm:$0xf] }
  0x2e   : > { %v193_v30 = vrot.slane %v192_v22, 2  ;;  %v200_v31 = vrot.slane %v199_v23, 2  ;;  %vm216_vm3 = vcmask 1043459   ;;  %v335_v32 = vadd.f32 %v334_v24, %v333_v18  ;;  %s634_s19 = sshll.u32 %s624_s13, 2 }
  0x2f   : > { %v342_v33 = vadd.f32 %v341_v25, %v340_v19  ;;  %v348_v34 = vrot.slane %v347_v26, 4  ;;  %v355_v35 = vrot.slane %v354_v27, 4  ;;  %v180_v36 = vadd.f32 %v179_v28, %v178_v20  ;;  %p164_p6 = scmp.lt.s32.totalorder %s634_s19, 7 }
  0x30   : > { %v187_v37 = vadd.f32 %v186_v29, %v185_v21  ;;  %v194_v38 = vadd.f32 %v193_v30, %v192_v22  ;;  %v201_v39 = vadd.f32 %v200_v31, %v199_v23  ;;  %vm218_vm4 = vcmask 130048   ;;  %v254_v21 = vld [vmem:[%s838_s22 + $0x13] sm:$0xf]  ;;  %v255_v30 = vld [vmem:[%s838_s22 + $0x23] sm:$0xf] }
  0x31   : > { %v336_v40 = vrot.slane %v335_v32, 2  ;;  %v343_v41 = vrot.slane %v342_v33, 2  ;;  %v349_v42 = vadd.f32 %v348_v34, %v347_v26  ;;  %v356_v43 = vadd.f32 %v355_v35, %v354_v27  ;;  %s981_s19 = smov (!%p164_p6, %s634_s19), 7 }
  0x32   : > { %v181_v44 = vrot.slane %v180_v36, 1  ;;  %v188_v45 = vrot.slane %v187_v37, 1  ;;  %v195_v46 = vrot.slane %v194_v38, 1  ;;  %v202_v47 = vrot.slane %v201_v39, 1  ;;  %s635_s27 = sshll.u32 %s981_s19, 3 }
  0x33   : > { %v337_v48 = vadd.f32 %v336_v40, %v335_v32  ;;  %v344_v49 = vadd.f32 %v343_v41, %v342_v33  ;;  %v350_v50 = vrot.slane %v349_v42, 2  ;;  %v357_v51 = vrot.slane %v356_v43, 2  ;;  %s915_s30 = scalar_lea.vmem %s972_s2, %s635_s27 }
  0x34   : > { %v182_v52 = vadd.f32 %v181_v44, %v180_v36  ;;  %v189_v53 = vadd.f32 %v188_v45, %v187_v37  ;;  %v196_v54 = vadd.f32 %v195_v46, %v194_v38  ;;  %v203_v55 = vadd.f32 %v202_v47, %v201_v39  ;;  %v256_v39 = vld [vmem:[%s838_s22 + $0x33] sm:$0xf] }
  0x35   : > { %v338_v57 = vrot.slane %v337_v48, 1  ;;  %v345_v58 = vrot.slane %v344_v49, 1  ;;  %v351_v59 = vadd.f32 %v350_v50, %v349_v42  ;;  %v358_v60 = vadd.f32 %v357_v51, %v356_v43 }
  0x36   : > { %v204_v63 = vmul.f32 0.25, %v182_v52  ;;  %v205_v0 = vmul.f32 0.25, %v189_v53  ;;  %v206_v1 = vmul.f32 0.25, %v196_v54  ;;  %v207_v2 = vmul.f32 0.25, %v203_v55 }
  0x37   : > { %v339_v3 = vadd.f32 %v338_v57, %v337_v48  ;;  %v346_v4 = vadd.f32 %v345_v58, %v344_v49  ;;  %v352_v5 = vrot.slane %v351_v59, 1  ;;  %v359_v6 = vrot.slane %v358_v60, 1 }
  0x38   : > { %v213_v7 = vsel %vm212_vm1, %v205_v0, %v204_v63  ;;  %v409_v9 = vsel %vm175_vm0, %v405_v56, 0.0  ;;  %v416_v10 = vsel %vm175_vm0, %v406_v61, 0.0  ;;  %v423_v11 = vsel %vm175_vm0, %v407_v62, 0.0 }
  0x39   : > { %v215_v12 = vsel %vm214_vm2, %v206_v1, %v213_v7  ;;  %v353_v13 = vadd.f32 %v352_v5, %v351_v59  ;;  %v360_v14 = vadd.f32 %v359_v6, %v358_v60  ;;  %v361_v15 = vmul.f32 0.25, %v339_v3 }
  0x3a   : > { %v217_v17 = vsel %vm216_vm3, %v207_v2, %v215_v12  ;;  %v362_v18 = vmul.f32 0.25, %v346_v4  ;;  %v410_v19 = vrot.slane %v409_v9, 4  ;;  %v417_v20 = vrot.slane %v416_v10, 4  ;;  %v481_v4 = vld [vmem:[%s838_s22 + $0xc] sm:$0xf] }
  0x3b   : > { %636 = vmatmul.msk.f32.vlgmr.msra.gmra.mxu0 %vm218_vm4, %v217_v17  ;;  %v363_v22 = vmul.f32 0.25, %v353_v13  ;;  %v364_v23 = vmul.f32 0.25, %v360_v14  ;;  %v424_v24 = vrot.slane %v423_v11, 4  ;;  %v430_v25 = vsel %vm175_vm0, %v408_v8, 0.0  ;;  %v482_v13 = vld [vmem:[%s838_s22 + $0x1c] sm:$0xf] }
  0x3c   : > { %v369_v26 = vsel %vm212_vm1, %v362_v18, %v361_v15  ;;  %v411_v27 = vadd.f32 %v410_v19, %v409_v9  ;;  %v418_v28 = vadd.f32 %v417_v20, %v416_v10  ;;  %v431_v29 = vrot.slane %v430_v25, 4 }
  0x3d   : > { %v370_v31 = vsel %vm214_vm2, %v363_v22, %v369_v26  ;;  %v425_v32 = vadd.f32 %v424_v24, %v423_v11  ;;  %v257_v33 = vsel %vm175_vm0, %v253_v16, 0.0  ;;  %v264_v34 = vsel %vm175_vm0, %v254_v21, 0.0  ;;  %v483_v22 = vld [vmem:[%s838_s22 + $0x2c] sm:$0xf] }
  0x3e   : > { %v371_v35 = vsel %vm216_vm3, %v364_v23, %v370_v31  ;;  %v412_v36 = vrot.slane %v411_v27, 2  ;;  %v419_v37 = vrot.slane %v418_v28, 2  ;;  %v432_v38 = vadd.f32 %v431_v29, %v430_v25  ;;  %v484_v23 = vld [vmem:[%s838_s22 + $0x3c] sm:$0xf] }
  0x3f   : > { %638 = vmatmul.msk.f32.vlgmr.msra.gmra.mxu2 %vm218_vm4, %v371_v35  ;;  %v426_v40 = vrot.slane %v425_v32, 2  ;;  %v258_v41 = vrot.slane %v257_v33, 4  ;;  %v265_v42 = vrot.slane %v264_v34, 4  ;;  %v271_v43 = vsel %vm175_vm0, %v255_v30, 0.0 }
  0x40   : > { %v413_v44 = vadd.f32 %v412_v36, %v411_v27  ;;  %v420_v45 = vadd.f32 %v419_v37, %v418_v28  ;;  %v433_v46 = vrot.slane %v432_v38, 2  ;;  %v272_v47 = vrot.slane %v271_v43, 4 }
  0x41   : > { %v427_v48 = vadd.f32 %v426_v40, %v425_v32  ;;  %v259_v49 = vadd.f32 %v258_v41, %v257_v33  ;;  %v266_v50 = vadd.f32 %v265_v42, %v264_v34  ;;  %v278_v51 = vsel %vm175_vm0, %v256_v39, 0.0 }
  0x42   : > { %v414_v52 = vrot.slane %v413_v44, 1  ;;  %v421_v53 = vrot.slane %v420_v45, 1  ;;  %v434_v54 = vadd.f32 %v433_v46, %v432_v38  ;;  %v273_v55 = vadd.f32 %v272_v47, %v271_v43 }
  0x43   : > { %v428_v56 = vrot.slane %v427_v48, 1  ;;  %v260_v57 = vrot.slane %v259_v49, 2  ;;  %v267_v58 = vrot.slane %v266_v50, 2  ;;  %v279_v59 = vrot.slane %v278_v51, 4 }
  0x44   : > { %v415_v60 = vadd.f32 %v414_v52, %v413_v44  ;;  %v422_v61 = vadd.f32 %v421_v53, %v420_v45  ;;  %v435_v62 = vrot.slane %v434_v54, 1  ;;  %v274_v63 = vrot.slane %v273_v55, 2 }
  0x45   : > { %v429_v0 = vadd.f32 %v428_v56, %v427_v48  ;;  %v261_v1 = vadd.f32 %v260_v57, %v259_v49  ;;  %v268_v2 = vadd.f32 %v267_v58, %v266_v50  ;;  %v280_v3 = vadd.f32 %v279_v59, %v278_v51 }
  0x46   : > { %v436_v5 = vadd.f32 %v435_v62, %v434_v54  ;;  %v437_v6 = vmul.f32 0.25, %v415_v60  ;;  %v438_v7 = vmul.f32 0.25, %v422_v61  ;;  %v275_v8 = vadd.f32 %v274_v63, %v273_v55 }
  0x47   : > { %v439_v9 = vmul.f32 0.25, %v429_v0  ;;  %v262_v10 = vrot.slane %v261_v1, 1  ;;  %v269_v11 = vrot.slane %v268_v2, 1  ;;  %v281_v12 = vrot.slane %v280_v3, 2 }
  0x48   : > { %v440_v14 = vmul.f32 0.25, %v436_v5  ;;  %v445_v15 = vsel %vm212_vm1, %v438_v7, %v437_v6  ;;  %v276_v16 = vrot.slane %v275_v8, 1  ;;  %v485_v17 = vsel %vm175_vm0, %v481_v4, 0.0 }
  0x49   : > { %v446_v18 = vsel %vm214_vm2, %v439_v9, %v445_v15  ;;  %v263_v19 = vadd.f32 %v262_v10, %v261_v1  ;;  %v270_v20 = vadd.f32 %v269_v11, %v268_v2  ;;  %v282_v21 = vadd.f32 %v281_v12, %v280_v3 }
  0x4a   : > { %v447_v24 = vsel %vm216_vm3, %v440_v14, %v446_v18  ;;  %v277_v25 = vadd.f32 %v276_v16, %v275_v8  ;;  %v486_v26 = vrot.slane %v485_v17, 4  ;;  %v492_v27 = vsel %vm175_vm0, %v482_v13, 0.0 }
  0x4b   : > { %639 = vmatmul.msk.f32.vlgmr.msra.gmra.mxu3 %vm218_vm4, %v447_v24  ;;  %v283_v28 = vrot.slane %v282_v21, 1  ;;  %v285_v29 = vmul.f32 0.25, %v263_v19  ;;  %v286_v30 = vmul.f32 0.25, %v270_v20  ;;  %v493_v31 = vrot.slane %v492_v27, 4 }
  0x4c   : > { %v287_v32 = vmul.f32 0.25, %v277_v25  ;;  %v487_v33 = vadd.f32 %v486_v26, %v485_v17  ;;  %v499_v34 = vsel %vm175_vm0, %v483_v22, 0.0  ;;  %v506_v35 = vsel %vm175_vm0, %v484_v23, 0.0 }
  0x4d   : > { %v284_v36 = vadd.f32 %v283_v28, %v282_v21  ;;  %v293_v37 = vsel %vm212_vm1, %v286_v30, %v285_v29  ;;  %v494_v38 = vadd.f32 %v493_v31, %v492_v27  ;;  %v500_v39 = vrot.slane %v499_v34, 4 }
  0x4e   : > { %v294_v40 = vsel %vm214_vm2, %v287_v32, %v293_v37  ;;  %v488_v41 = vrot.slane %v487_v33, 2  ;;  %v507_v42 = vrot.slane %v506_v35, 4  ;;  %vm248_vm5 = vcmask 32768  }
  0x4f   : > { %v288_v43 = vmul.f32 0.25, %v284_v36  ;;  %v495_v44 = vrot.slane %v494_v38, 2  ;;  %v501_v45 = vadd.f32 %v500_v39, %v499_v34 }
  0x50   : > { %v489_v46 = vadd.f32 %v488_v41, %v487_v33  ;;  %v508_v47 = vadd.f32 %v507_v42, %v506_v35 }
  0x51   : > { %v295_v48 = vsel %vm216_vm3, %v288_v43, %v294_v40  ;;  %v496_v49 = vadd.f32 %v495_v44, %v494_v38  ;;  %v502_v50 = vrot.slane %v501_v45, 2 }
  0x52   : > { %637 = vmatmul.msk.f32.vlgmr.msra.gmra.mxu1 %vm218_vm4, %v295_v48  ;;  %v490_v51 = vrot.slane %v489_v46, 1  ;;  %v509_v52 = vrot.slane %v508_v47, 2 }
  0x53   : > { %v497_v53 = vrot.slane %v496_v49, 1  ;;  %v503_v54 = vadd.f32 %v502_v50, %v501_v45 }
  0x54   : > { %v491_v55 = vadd.f32 %v490_v51, %v489_v46  ;;  %v510_v56 = vadd.f32 %v509_v52, %v508_v47 }
  0x55   : > { %v498_v57 = vadd.f32 %v497_v53, %v496_v49  ;;  %v504_v58 = vrot.slane %v503_v54, 1 }
  0x56   : > { %v511_v59 = vrot.slane %v510_v56, 1  ;;  %v513_v60 = vmul.f32 0.25, %v491_v55 }
  0x57   : > { %v505_v61 = vadd.f32 %v504_v58, %v503_v54  ;;  %v514_v62 = vmul.f32 0.25, %v498_v57 }
  0x58   : > { %v512_v63 = vadd.f32 %v511_v59, %v510_v56 }
  0x59   : > { %v515_v0 = vmul.f32 0.25, %v505_v61  ;;  %v521_v1 = vsel %vm212_vm1, %v514_v62, %v513_v60 }
  0x5a   : > { %v516_v2 = vmul.f32 0.25, %v512_v63 }
  0x5b   : > { %v522_v3 = vsel %vm214_vm2, %v515_v0, %v521_v1 }
  0x5c   : > { %v523_v4 = vsel %vm216_vm3, %v516_v2, %v522_v3 }
  0x5d   : > { %640 = vmatmul.msk.f32.vlgmr.msrb.gmra.mxu0 %vm218_vm4, %v523_v4 }
  0xb8   : > { %v238_v5 = vpop.f32.mrf.mxu0 }
  0xb9   : > { %v242_v6 = vrot.slane %v238_v5, 1  ;;  %v243_v7 = vrot.slane %v238_v5, 2  ;;  %249 = vst.msk [vmem:[%s915_s30] sm:$0x1] %vm248_vm5, %v238_v5  ;;  %v244_v8 = vrot.slane %v238_v5, 3 }
  0xbb   : > { %250 = vst.msk [vmem:[%s915_s30 + $0x8] sm:$0x1] %vm248_vm5, %v242_v6 }
  0xbc   : > { %251 = vst.msk [vmem:[%s915_s30 + $0x10] sm:$0x1] %vm248_vm5, %v243_v7 }
  0xbd   : > { %252 = vst.msk [vmem:[%s915_s30 + $0x18] sm:$0x1] %vm248_vm5, %v244_v8 }
  0xc2   : > { %v391_v9 = vpop.f32.mrf.mxu2 }
  0xc3   : > { %v395_v10 = vrot.slane %v391_v9, 1  ;;  %v396_v11 = vrot.slane %v391_v9, 2  ;;  %v397_v12 = vrot.slane %v391_v9, 3  ;;  %401 = vst.msk [vmem:[%s915_s30 + $0x2] sm:$0x1] %vm248_vm5, %v391_v9 }
  0xc5   : > { %402 = vst.msk [vmem:[%s915_s30 + $0xa] sm:$0x1] %vm248_vm5, %v395_v10 }
  0xc6   : > { %403 = vst.msk [vmem:[%s915_s30 + $0x12] sm:$0x1] %vm248_vm5, %v396_v11 }
  0xc7   : > { %404 = vst.msk [vmem:[%s915_s30 + $0x1a] sm:$0x1] %vm248_vm5, %v397_v12 }
  0xce   : > { %v467_v13 = vpop.f32.mrf.mxu3 }
  0xcf   : > { %v315_v14 = vpop.f32.mrf.mxu1  ;;  %v471_v15 = vrot.slane %v467_v13, 1  ;;  %477 = vst.msk [vmem:[%s915_s30 + $0x3] sm:$0x1] %vm248_vm5, %v467_v13  ;;  %v472_v19 = vrot.slane %v467_v13, 2  ;;  %v473_v20 = vrot.slane %v467_v13, 3 }
  0xd0   : > { %v319_v16 = vrot.slane %v315_v14, 1  ;;  %v320_v17 = vrot.slane %v315_v14, 2  ;;  %v321_v18 = vrot.slane %v315_v14, 3  ;;  %325 = vst.msk [vmem:[%s915_s30 + $0x1] sm:$0x1] %vm248_vm5, %v315_v14 }
  0xd1   : > { %478 = vst.msk [vmem:[%s915_s30 + $0xb] sm:$0x1] %vm248_vm5, %v471_v15 }
  0xd2   : > { %326 = vst.msk [vmem:[%s915_s30 + $0x9] sm:$0x1] %vm248_vm5, %v319_v16 }
  0xd3   : > { %327 = vst.msk [vmem:[%s915_s30 + $0x11] sm:$0x1] %vm248_vm5, %v320_v17 }
  0xd4   : > { %328 = vst.msk [vmem:[%s915_s30 + $0x19] sm:$0x1] %vm248_vm5, %v321_v18 }
  0xd5   : > { %479 = vst.msk [vmem:[%s915_s30 + $0x13] sm:$0x1] %vm248_vm5, %v472_v19 }
  0xd6   : > { %480 = vst.msk [vmem:[%s915_s30 + $0x1b] sm:$0x1] %vm248_vm5, %v473_v20 }
  0xda   : > { %v543_v21 = vpop.f32.mrf.mxu0 }
  0xdb   : > { %v547_v22 = vrot.slane %v543_v21, 1  ;;  %v548_v23 = vrot.slane %v543_v21, 2  ;;  %553 = vst.msk [vmem:[%s915_s30 + $0x4] sm:$0x1] %vm248_vm5, %v543_v21  ;;  %v549_v24 = vrot.slane %v543_v21, 3 }
  0xdd   : > { %554 = vst.msk [vmem:[%s915_s30 + $0xc] sm:$0x1] %vm248_vm5, %v547_v22 }
  0xde   : > { %555 = vst.msk [vmem:[%s915_s30 + $0x14] sm:$0x1] %vm248_vm5, %v548_v23 }
  0xdf   : > { %556 = vst.msk [vmem:[%s915_s30 + $0x1c] sm:$0x1] %vm248_vm5, %v549_v24 }
  0xe0 PF: > { %p12_p7 = scmp.ge.s32.totalorder %s789_s14, 4   ;;  %s976_s9 = smov %s742_s10 }
  0xe1   : > { %s977_s10 = smov %s746_s11  ;;  %s978_s11 = smov %s799_s17 }
  0xe2   : > { %s979_s12 = smov %s789_s14  ;;  %14 = sbr.rel (!%p12_p7) target bundleno = 3 (0x3), region = 68 }
  0xe7   :  { %579 = vsyncpa [#allocation3], 1 }
  0xe8   :  { %581 = vsyncpa [#allocation3 + $0x1], 1 }

</bundles_post_ra>
